<compile_context>
chip_gen: v7x
topology: tpu7x:2x2x1
jax: 0.10.0
libtpu: 0.0.40
codegen_flags: <defaults>
</compile_context>

<pallas_src>
import functools

import jax
import jax.numpy as jnp
from jax.experimental import pallas as pl
from jax.experimental.pallas import tpu as pltpu


_NEG_LOGIT_PAD = -1e9  # finite pad logit: max(x,0) - x*0 + log1p(exp(-|x|)) == 0 exactly
_ROW_GRAIN = 32        # row-tile granularity: safe sublane packing for f32/bf16/int8


def _round_up(x, m):
    return ((x + m - 1) // m) * m


@functools.lru_cache(maxsize=1)
def _tpu_generation():
    """Returns (#TensorCores per chip, VMEM capacity bytes), with safe fallbacks."""
    num_tc = 1
    vmem_cap = 64 * 1024 * 1024  # conservative (v7x per-TC VMEM)
    try:
        vmem_cap = int(pltpu.get_tpu_info().vmem_capacity_bytes)
    except Exception:
        pass
    try:
        kind = jax.devices()[0].device_kind.lower()
        if "v7" in kind:
            num_tc = 2  # v7x: 2 TensorCores per chip
    except Exception:
        pass
    return num_tc, vmem_cap


def _bce_sum_count_kernel(pred_ref, gold_ref, sum_ref, cnt_ref, acc_sum, acc_cnt,
                          *, softplus_in_bf16=False):
    """Per split: accumulate masked BCE-with-logits sum and selected-row count."""
    j = pl.program_id(1)  # row-block index inside this split (reduction axis)

    @pl.when(j == 0)
    def _init():
        acc_sum[...] = jnp.zeros_like(acc_sum)
        acc_cnt[...] = jnp.zeros_like(acc_cnt)

    x = pred_ref[...].astype(jnp.float32)     # logits       (br, cp)
    y_raw = gold_ref[...]                     # 0/1 labels, int8/bf16/f32
    y = y_raw.astype(jnp.float32)

    # Numerically stable BCE with logits (matches torch.nn.BCEWithLogitsLoss):
    #   max(x, 0) - x*y + log1p(exp(-|x|))
    neg_abs = -jnp.abs(x)
    if softplus_in_bf16:
        # v7x EUP lever (2x transcendental throughput); OFF by default until
        # tolerance-validated.  Never enable on v5e (no bf16 EUP).
        softplus = jnp.log1p(jnp.exp(neg_abs.astype(jnp.bfloat16))).astype(jnp.float32)
    else:
        softplus = jnp.log1p(jnp.exp(neg_abs))
    per_elem = jnp.maximum(x, 0.0) - x * y + softplus

    br, cp = per_elem.shape

    # Row is "selected" iff the gold row has at least one positive label.
    # Lane reduce done on the otherwise-idle MXU: exact because gold is 0/1
    # (bf16-representable) and the MXU accumulates in f32.
    row_pos = jnp.dot(y_raw.astype(jnp.bfloat16),
                      jnp.ones((cp, 1), jnp.bfloat16),
                      preferred_element_type=jnp.float32)        # (br, 1)
    row_sel = row_pos > 0.0                                      # (br, 1) bool
    masked = jnp.where(row_sel, per_elem, 0.0)                   # NaN-safe masking

    # vreg-shaped partial accumulation: splitting the sublane axis is layout-free
    # and the axis-0 reduce is elementwise VPU adds -> no per-step XLU scalar
    # reduce, no per-step masked (1,1) store.
    acc_sum[...] += jnp.sum(masked.reshape(br // 8, 8, cp), axis=0)
    acc_cnt[...] += jnp.sum(row_sel.astype(jnp.float32).reshape(br // 8, 8, 1), axis=0)

    @pl.when(j == pl.num_programs(1) - 1)
    def _finalize():
        sum_ref[...] = jnp.sum(acc_sum[...]).reshape(1, 1, 1)
        cnt_ref[...] = jnp.sum(acc_cnt[...]).reshape(1, 1, 1)


@functools.partial(
    jax.jit,
    static_argnames=("n_splits", "max_block_rows", "softplus_in_bf16"),
)
def _bce_sum_count(pred, gold, *, n_splits=None, max_block_rows=1024,
                   softplus_in_bf16=False):
    """Returns (sum of per-element BCE over selected rows, #selected rows)."""
    n, c = pred.shape
    assert gold.shape == (n, c)

    num_tc, vmem_cap = _tpu_generation()
    if n_splits is None:
        n_splits = num_tc  # 1 on v5e/v6e (single TC), 2 on v7x

    # ---- pad the class axis to a lane multiple (128).  Padded pred columns use a
    # large negative FINITE logit (BCE term exactly 0); padded gold columns are 0
    # so row selection is unchanged.
    c_pad = _round_up(c, 128)
    if c_pad != c:
        pred = jnp.pad(pred, ((0, 0), (0, c_pad - c)), constant_values=_NEG_LOGIT_PAD)
        gold = jnp.pad(gold, ((0, 0), (0, c_pad - c)), constant_values=0)

    p_item = pred.dtype.itemsize
    g_item = gold.dtype.itemsize

    # ---- generation-aware row tile: per-row working set = double-buffered inputs
    # + ~6 f32 temps (x, y, |x|, softplus, per_elem, masked).
    per_row_bytes = c_pad * (2 * (p_item + g_item) + 6 * 4)
    target_total = min(vmem_cap // 2, 48 << 20)
    block_rows = max(_ROW_GRAIN,
                     min(max_block_rows,
                         (target_total // per_row_bytes) // _ROW_GRAIN * _ROW_GRAIN))

    # ---- split the row range into independent partial reductions; the leading
    # "parallel" grid axis can be sharded across TensorCores on megacore parts.
    n_splits = int(max(1, min(n_splits, _round_up(n, _ROW_GRAIN) // _ROW_GRAIN)))
    rows_per_split = _round_up(-(-n // n_splits), _ROW_GRAIN)
    block_rows = min(block_rows, rows_per_split)
    # Divisor-friendly tile: re-derive block_rows from the block count so the
    # final round-up pads at most _ROW_GRAIN-1 rows.
    blocks_per_split = -(-rows_per_split // block_rows)
    block_rows = _round_up(-(-rows_per_split // blocks_per_split), _ROW_GRAIN)
    blocks_per_split = -(-rows_per_split // block_rows)
    rows_per_split = blocks_per_split * block_rows

    n_pad = n_splits * rows_per_split
    if n_pad != n:
        # Padded rows: gold all-zero -> never selected; pred zeros -> finite.
        pred = jnp.pad(pred, ((0, n_pad - n), (0, 0)))
        gold = jnp.pad(gold, ((0, n_pad - n), (0, 0)))

    # Scoped-VMEM limit: input double-buffers + scaled f32-temp estimate +
    # scratch + headroom, never overcommitting the physical VMEM (64 MiB on v7x).
    vmem_limit = int(min(vmem_cap - (8 << 20),
                         block_rows * per_row_bytes + 8 * c_pad * 4 + (16 << 20)))

    cost = pl.CostEstimate(
        flops=int(8 * n_pad * c_pad),
        transcendentals=int(2 * n_pad * c_pad),
        bytes_accessed=int(n_pad * c_pad * (p_item + g_item) + 8 * n_splits),
    )

    kernel = functools.partial(_bce_sum_count_kernel,
                               softplus_in_bf16=softplus_in_bf16)

    sums, cnts = pl.pallas_call(
        kernel,
        out_shape=(
            jax.ShapeDtypeStruct((n_splits, 1, 1), jnp.float32),
            jax.ShapeDtypeStruct((n_splits, 1, 1), jnp.float32),
        ),
        grid_spec=pltpu.PrefetchScalarGridSpec(
            num_scalar_prefetch=0,
            grid=(n_splits, blocks_per_split),
            in_specs=[
                pl.BlockSpec((block_rows, c_pad),
                             lambda s, j: (s * blocks_per_split + j, 0)),
                pl.BlockSpec((block_rows, c_pad),
                             lambda s, j: (s * blocks_per_split + j, 0)),
            ],
            out_specs=[
                pl.BlockSpec((1, 1, 1), lambda s, j: (s, 0, 0)),
                pl.BlockSpec((1, 1, 1), lambda s, j: (s, 0, 0)),
            ],
            scratch_shapes=[
                pltpu.VMEM((8, c_pad), jnp.float32),   # partial loss sums
                pltpu.VMEM((8, 1), jnp.float32),       # partial row counts
            ],
        ),
        compiler_params=pltpu.CompilerParams(
            dimension_semantics=("parallel", "arbitrary"),
            vmem_limit_bytes=vmem_limit,
        ),
        cost_estimate=cost,
    )(pred, gold)

    return jnp.sum(sums), jnp.sum(cnts)


def multi_layer_loss(pred_labels, gold_labels, label_namespace=("labels",)):
    """JAX/Pallas equivalent of MultiLayerLoss.forward."""
    loss = None
    for (name1, pred), (name2, gold) in zip(pred_labels.items(), gold_labels.items()):
        assert name1 == name2, (
            f"{name1} is not equal to {name2}, in MultiLayerLoss calculate."
        )
        if name1 not in label_namespace:
            continue
        if gold is None:
            continue
        n, c = pred.shape
        s, cnt = _bce_sum_count(pred, gold)
        # BCEWithLogitsLoss(reduction='mean') over selected rows; a namespace with
        # zero selected rows contributes 0 (PyTorch would skip it).
        contrib = jnp.where(cnt > 0, s / (jnp.maximum(cnt, 1.0) * c), 0.0)
        loss = contrib if loss is None else loss + contrib
    return loss


def _reference_loss(pred_labels, gold_labels, label_namespace=("labels",)):
    """Pure-JAX reference for validation."""
    loss = None
    for (name1, pred), (name2, gold) in zip(pred_labels.items(), gold_labels.items()):
        assert name1 == name2
        if name1 not in label_namespace or gold is None:
            continue
        sel = jnp.sum(gold.astype(jnp.float32), axis=-1) > 0
        x = pred[sel].astype(jnp.float32)
        y = gold[sel].astype(jnp.float32)
        per_elem = jnp.maximum(x, 0.0) - x * y + jnp.log1p(jnp.exp(-jnp.abs(x)))
        l = jnp.mean(per_elem)
        loss = l if loss is None else loss + l
    return loss


if __name__ == "__main__":
    key = jax.random.PRNGKey(0)
    # Deliberately awkward shapes: N not a multiple of the row grain, C not a
    # multiple of 128, to exercise the padding paths.
    N, C = 19, 200

    k1, k2, k3, k4 = jax.random.split(key, 4)

    # 'labels' namespace (used in the loss).  Gold is 0/1 -> stored as int8 to
    # minimize its HBM traffic (exactly representable); pred stays f32.
    # (bf16 pred is a further v5e lever; kept f32 pending tolerance validation.)
    pred_labels_arr = jax.random.normal(k1, (N, C), dtype=jnp.float32)
    gold_labels_arr = (jax.random.uniform(k2, (N, C)) < 0.1).astype(jnp.int8)
    # force a few rows to be empty (not selected)
    gold_labels_arr = gold_labels_arr.at[3].set(0)
    gold_labels_arr = gold_labels_arr.at[10].set(0)

    # an extra namespace NOT in label_namespace — must be skipped
    pred_other = jax.random.normal(k3, (N, C), dtype=jnp.float32)
    gold_other = (jax.random.uniform(k4, (N, C)) < 0.1).astype(jnp.int8)

    pred_labels = {"labels": pred_labels_arr, "other": pred_other}
    gold_labels = {"labels": gold_labels_arr, "other": gold_other}

    loss = multi_layer_loss(pred_labels, gold_labels)
    loss = jax.block_until_ready(loss)

    ref = _reference_loss(pred_labels, gold_labels)
    assert jnp.allclose(loss, ref, rtol=1e-4, atol=1e-5), (loss, ref)

    print("KERNEL_OK")
</pallas_src>

<mosaic_0001>
module attributes {stable_mosaic.version = 11 : i64} {
  func.func @_bce_sum_count_kernel(%arg0: i32, %arg1: i32, %arg2: memref<32x256xf32, #tpu.memory_space<vmem>>, %arg3: memref<32x256xi8, #tpu.memory_space<vmem>>, %arg4: memref<1x1x1xf32, #tpu.memory_space<vmem>>, %arg5: memref<1x1x1xf32, #tpu.memory_space<vmem>>, %arg6: memref<8x256xf32, #tpu.memory_space<vmem>>, %arg7: memref<8x1xf32, #tpu.memory_space<vmem>>) attributes {dimension_semantics = [#tpu.dimension_semantics<parallel>, #tpu.dimension_semantics<arbitrary>], iteration_bounds = array<i64: 1, 1>, scalar_prefetch = 0 : i64, scratch_operands = 2 : i64, tpu.core_type = #tpu.core_type<tc>, window_params = [{transform_indices = @transform_0, window_bounds = array<i64: 32, 256>}, {transform_indices = @transform_1, window_bounds = array<i64: 32, 256>}, {transform_indices = @transform_2, window_bounds = array<i64: 1, 1, 1>}, {transform_indices = @transform_3, window_bounds = array<i64: 1, 1, 1>}]} {
    %c0_i32 = arith.constant 0 : i32
    %0 = arith.cmpi eq, %arg1, %c0_i32 : i32
    %1 = arith.extui %0 : i1 to i32
    %c0_i32_0 = arith.constant 0 : i32
    %2 = arith.cmpi ne, %1, %c0_i32_0 : i32
    scf.if %2 {
      %cst_21 = arith.constant 0.000000e+00 : f32
      %40 = vector.broadcast %cst_21 : f32 to vector<8x256xf32>
      %c0_22 = arith.constant 0 : index
      %c0_23 = arith.constant 0 : index
      %41 = vector.load %arg6[%c0_22, %c0_23] : memref<8x256xf32, #tpu.memory_space<vmem>>, vector<8x256xf32>
      tpu.vector_store %arg6[%c0_22, %c0_23], %40 {strides = array<i32>} : memref<8x256xf32, #tpu.memory_space<vmem>>, vector<8x256xf32>,
      %cst_24 = arith.constant 0.000000e+00 : f32
      %42 = vector.broadcast %cst_24 : f32 to vector<8x1xf32>
      %c0_25 = arith.constant 0 : index
      %c0_26 = arith.constant 0 : index
      %43 = vector.load %arg7[%c0_25, %c0_26] : memref<8x1xf32, #tpu.memory_space<vmem>>, vector<8x1xf32>
      tpu.vector_store %arg7[%c0_25, %c0_26], %42 {strides = array<i32>} : memref<8x1xf32, #tpu.memory_space<vmem>>, vector<8x1xf32>,
    } else {
    }
    %c0 = arith.constant 0 : index
    %c0_1 = arith.constant 0 : index
    %3 = vector.load %arg2[%c0, %c0_1] : memref<32x256xf32, #tpu.memory_space<vmem>>, vector<32x256xf32>
    %c0_2 = arith.constant 0 : index
    %c0_3 = arith.constant 0 : index
    %4 = vector.load %arg3[%c0_2, %c0_3] : memref<32x256xi8, #tpu.memory_space<vmem>>, vector<32x256xi8>
    %5 = arith.sitofp %4 : vector<32x256xi8> to vector<32x256xf32>
    %6 = math.absf %3 : vector<32x256xf32>
    %cst = arith.constant 0.000000e+00 : f32
    %7 = vector.broadcast %cst : f32 to vector<32x256xf32>
    %8 = arith.subf %7, %6 : vector<32x256xf32>
    %9 = math.exp %8 : vector<32x256xf32>
    %10 = math.log1p %9 : vector<32x256xf32>
    %cst_4 = arith.constant 0.000000e+00 : f32
    %11 = vector.broadcast %cst_4 : f32 to vector<32x256xf32>
    %12 = arith.maximumf %3, %11 : vector<32x256xf32>
    %13 = arith.mulf %3, %5 : vector<32x256xf32>
    %14 = arith.subf %12, %13 : vector<32x256xf32>
    %15 = arith.addf %14, %10 : vector<32x256xf32>
    %16 = arith.sitofp %4 : vector<32x256xi8> to vector<32x256xbf16>
    %cst_5 = arith.constant 1.000000e+00 : bf16
    %17 = vector.broadcast %cst_5 : bf16 to vector<256x1xbf16>
    %cst_6 = arith.constant dense<0.000000e+00> : vector<32x1xf32>
    %18 = tpu.matmul %16, %17, %cst_6 {dimension_numbers = #tpu.dot_dimension_numbers<[1], [0], [0], [1], [0, 0, 1, 1], [], []>} : vector<32x256xbf16>, vector<256x1xbf16>, vector<32x1xf32> -> vector<32x1xf32>
    %cst_7 = arith.constant 0.000000e+00 : f32
    %19 = vector.broadcast %cst_7 : f32 to vector<32x1xf32>
    %20 = arith.cmpf ogt, %18, %19 : vector<32x1xf32>
    %cst_8 = arith.constant 0.000000e+00 : f32
    %21 = vector.shape_cast %20 : vector<32x1xi1> to vector<32x1xi1>
    %22 = vector.broadcast %21 : vector<32x1xi1> to vector<32x256xi1>
    %23 = vector.broadcast %cst_8 : f32 to vector<32x256xf32>
    %24 = arith.select %22, %15, %23 : vector<32x256xi1>, vector<32x256xf32>
    %c0_9 = arith.constant 0 : index
    %c0_10 = arith.constant 0 : index
    %25 = vector.load %arg6[%c0_9, %c0_10] : memref<8x256xf32, #tpu.memory_space<vmem>>, vector<8x256xf32>
    %26 = vector.shape_cast %24 : vector<32x256xf32> to vector<4x8x256xf32>
    %cst_11 = arith.constant dense<0.000000e+00> : vector<8x256xf32>
    %27 = vector.multi_reduction <add>, %26, %cst_11 [0] : vector<4x8x256xf32> to vector<8x256xf32>
    %28 = arith.addf %25, %27 : vector<8x256xf32>
    %c0_12 = arith.constant 0 : index
    %c0_13 = arith.constant 0 : index
    %29 = vector.load %arg6[%c0_12, %c0_13] : memref<8x256xf32, #tpu.memory_space<vmem>>, vector<8x256xf32>
    tpu.vector_store %arg6[%c0_12, %c0_13], %28 {strides = array<i32>} : memref<8x256xf32, #tpu.memory_space<vmem>>, vector<8x256xf32>,
    %c0_14 = arith.constant 0 : index
    %c0_15 = arith.constant 0 : index
    %30 = vector.load %arg7[%c0_14, %c0_15] : memref<8x1xf32, #tpu.memory_space<vmem>>, vector<8x1xf32>
    %31 = arith.extui %20 : vector<32x1xi1> to vector<32x1xi32>
    %32 = arith.sitofp %31 : vector<32x1xi32> to vector<32x1xf32>
    %33 = vector.shape_cast %32 : vector<32x1xf32> to vector<4x8x1xf32>
    %cst_16 = arith.constant dense<0.000000e+00> : vector<8x1xf32>
    %34 = vector.multi_reduction <add>, %33, %cst_16 [0] : vector<4x8x1xf32> to vector<8x1xf32>
    %35 = arith.addf %30, %34 : vector<8x1xf32>
    %c0_17 = arith.constant 0 : index
    %c0_18 = arith.constant 0 : index
    %36 = vector.load %arg7[%c0_17, %c0_18] : memref<8x1xf32, #tpu.memory_space<vmem>>, vector<8x1xf32>
    tpu.vector_store %arg7[%c0_17, %c0_18], %35 {strides = array<i32>} : memref<8x1xf32, #tpu.memory_space<vmem>>, vector<8x1xf32>,
    %c0_i32_19 = arith.constant 0 : i32
    %37 = arith.cmpi eq, %arg1, %c0_i32_19 : i32
    %38 = arith.extui %37 : i1 to i32
    %c0_i32_20 = arith.constant 0 : i32
    %39 = arith.cmpi ne, %38, %c0_i32_20 : i32
    scf.if %39 {
      %c0_21 = arith.constant 0 : index
      %c0_22 = arith.constant 0 : index
      %40 = vector.load %arg6[%c0_21, %c0_22] : memref<8x256xf32, #tpu.memory_space<vmem>>, vector<8x256xf32>
      %41 = vector.shape_cast %40 : vector<8x256xf32> to vector<1x8x256xf32>
      %cst_23 = arith.constant dense<0.000000e+00> : vector<1xf32>
      %42 = vector.multi_reduction <add>, %41, %cst_23 [1, 2] : vector<1x8x256xf32> to vector<1xf32>
      %43 = vector.shape_cast %42 : vector<1xf32> to vector<1x1x1xf32>
      %44 = vector.extract %43[0, 0, 0] : f32 from vector<1x1x1xf32>
      %45 = vector.broadcast %44 : f32 to vector<1x1x1xf32>
      %c0_24 = arith.constant 0 : index
      %c0_25 = arith.constant 0 : index
      %c0_26 = arith.constant 0 : index
      %46 = vector.load %arg4[%c0_24, %c0_25, %c0_26] : memref<1x1x1xf32, #tpu.memory_space<vmem>>, vector<1x1x1xf32>
      tpu.vector_store %arg4[%c0_24, %c0_25, %c0_26], %45 {strides = array<i32>} : memref<1x1x1xf32, #tpu.memory_space<vmem>>, vector<1x1x1xf32>,
      %c0_27 = arith.constant 0 : index
      %c0_28 = arith.constant 0 : index
      %47 = vector.load %arg7[%c0_27, %c0_28] : memref<8x1xf32, #tpu.memory_space<vmem>>, vector<8x1xf32>
      %48 = vector.shape_cast %47 : vector<8x1xf32> to vector<1x8x1xf32>
      %cst_29 = arith.constant dense<0.000000e+00> : vector<1xf32>
      %49 = vector.multi_reduction <add>, %48, %cst_29 [1, 2] : vector<1x8x1xf32> to vector<1xf32>
      %50 = vector.shape_cast %49 : vector<1xf32> to vector<1x1x1xf32>
      %51 = vector.extract %50[0, 0, 0] : f32 from vector<1x1x1xf32>
      %52 = vector.broadcast %51 : f32 to vector<1x1x1xf32>
      %c0_30 = arith.constant 0 : index
      %c0_31 = arith.constant 0 : index
      %c0_32 = arith.constant 0 : index
      %53 = vector.load %arg5[%c0_30, %c0_31, %c0_32] : memref<1x1x1xf32, #tpu.memory_space<vmem>>, vector<1x1x1xf32>
      tpu.vector_store %arg5[%c0_30, %c0_31, %c0_32], %52 {strides = array<i32>} : memref<1x1x1xf32, #tpu.memory_space<vmem>>, vector<1x1x1xf32>,
    } else {
    }
    return
  }
  func.func @transform_0(%arg0: i32, %arg1: i32) -> (i32, i32) {
    %c1_i32 = arith.constant 1 : i32
    %0 = arith.muli %arg0, %c1_i32 : i32
    %1 = arith.addi %0, %arg1 : i32
    %c0_i32 = arith.constant 0 : i32
    %c0_i32_0 = arith.constant 0 : i32
    return %1, %c0_i32 : i32, i32
  }
  func.func @transform_1(%arg0: i32, %arg1: i32) -> (i32, i32) {
    %c1_i32 = arith.constant 1 : i32
    %0 = arith.muli %arg0, %c1_i32 : i32
    %1 = arith.addi %0, %arg1 : i32
    %c0_i32 = arith.constant 0 : i32
    %c0_i32_0 = arith.constant 0 : i32
    return %1, %c0_i32 : i32, i32
  }
  func.func @transform_2(%arg0: i32, %arg1: i32) -> (i32, i32, i32) {
    %c0_i32 = arith.constant 0 : i32
    %c0_i32_0 = arith.constant 0 : i32
    %c0_i32_1 = arith.constant 0 : i32
    return %arg0, %c0_i32, %c0_i32_0 : i32, i32, i32
  }
  func.func @transform_3(%arg0: i32, %arg1: i32) -> (i32, i32, i32) {
    %c0_i32 = arith.constant 0 : i32
    %c0_i32_0 = arith.constant 0 : i32
    %c0_i32_1 = arith.constant 0 : i32
    return %arg0, %c0_i32, %c0_i32_0 : i32, i32, i32
  }
}

</mosaic_0001>

<bundles_post_ra>
// kernel: _bce_sum_count.1
= control target key start
LH: loop header
LB: loop body
LE: loop exit
PB: predicated region body
PF: predicated region fallthrough
CT: control target
= control target key end

     0   :  { %9 = vsyncpa [#allocation5], 0  ;;  %s828_s0 = inlined_call_operand.vmem [shape: f32[32,256], index: 0, kind: input, shape index: {}]   ;;  %s829_s1 = inlined_call_operand.vmem [shape: s8[32,256], index: 1, kind: input, shape index: {}]   ;;  %s830_s2 = inlined_call_operand.hbm [shape: f32[1,1,1], index: 2, kind: output, shape index: {0}]   ;;  %s831_s3 = inlined_call_operand.hbm [shape: f32[1,1,1], index: 3, kind: output, shape index: {1}]  }
   0x1   :  { %v582_v0 = vld [vmem:[%s829_s1 + $0x8] sm:$0xff] }
   0x2   :  { %10 = vsyncpa [#allocation7], 0  ;;  %v554_v1 = vmov 1065369472   ;;  %v233_v2 = vunpack.c.l.s8.bf16 %v582_v0  ;;  %v235_v3 = vunpack.c.h.s8.bf16 %v582_v0  ;;  %v589_v4 = vld [vmem:[%s829_s1] sm:$0xff]  ;;  %vm68_vm0 = vcmask 7168  }
   0x3   :  { %419 = vmatprep.subr.bf16.mxu0 %v554_v1  ;;  %447 = vmatprep.subr.bf16.mxu1 %v554_v1  ;;  %v232_v5 = vunpack.c.l.s8.bf16 %v589_v4  ;;  %v234_v6 = vunpack.c.h.s8.bf16 %v589_v4  ;;  %v555_v7 = vmov 0.0   ;;  %v556_v8 = vmov 0   ;;  %v603_v40 = vld [vmem:[%s828_s0] sm:$0xff]  ;;  %v613_v42 = vld [vmem:[%s828_s0 + $0x28] sm:$0xff]  ;;  %v627_v51 = vld [vmem:[%s828_s0 + $0x30] sm:$0xff]  ;;  %s558_s5 = smov [#allocation6]  }
   0x4   :  { %420 = vmatpush3.bf16.msra.mxu0 %v554_v1  ;;  %455 = vmatpush3.bf16.msra.mxu1 %v554_v1  ;;  %69 = vst.msk [vmem:[#allocation3] sm:$0xff] %vm68_vm0, %v555_v7  ;;  %v608_v41 = vld [vmem:[%s828_s0 + $0x20] sm:$0xff]  ;;  %v96_v43 = vand.u32 2147483647, %v603_v40  ;;  %v101_v45 = vand.u32 2147483647, %v613_v42 }
   0x5   :  { %421 = vmatprep.subr.bf16.mxu0 %v554_v1  ;;  %448 = vmatprep.subr.bf16.mxu1 %v554_v1  ;;  %v100_v44 = vand.u32 2147483647, %v608_v41  ;;  %v621_v46 = vld [vmem:[%s828_s0 + $0x8] sm:$0xff]  ;;  %v632_v53 = vld [vmem:[%s828_s0 + $0x38] sm:$0xff]  ;;  %v102_v56 = vand.u32 2147483647, %v627_v51 }
   0x6   :  { %268 = vmatprep.mubr.bf16.mxu0 %v233_v2  ;;  %276 = vmatprep.mubr.bf16.mxu1 %v235_v3  ;;  %v104_v47 = vsub.f32 0.0, %v96_v43  ;;  %v97_v49 = vand.u32 2147483647, %v621_v46  ;;  %v109_v50 = vsub.f32 0.0, %v101_v45  ;;  %v638_v57 = vld [vmem:[%s828_s0 + $0x10] sm:$0xff]  ;;  %v643_v59 = vld [vmem:[%s828_s0 + $0x18] sm:$0xff] }
   0x7   :  { %473 = vset.pattern.permute.xlu1 %v556_v8  ;;  %472 = vset.pattern.permute.xlu0 %v556_v8  ;;  %v108_v48 = vsub.f32 0.0, %v100_v44  ;;  %v103_v60 = vand.u32 2147483647, %v632_v53  ;;  %v98_v61 = vand.u32 2147483647, %v638_v57  ;;  %v110_v63 = vsub.f32 0.0, %v102_v56 }
   0x8   :  { %422 = vmatpush3.bf16.msra.mxu0 %v554_v1  ;;  %456 = vmatpush3.bf16.msra.mxu1 %v554_v1  ;;  %v112_v52 = vmul.f32 1.442695, %v104_v47  ;;  %v105_v55 = vsub.f32 0.0, %v97_v49  ;;  %v122_v58 = vmul.f32 1.442695, %v109_v50  ;;  %s557_s0 = smov [#allocation4]  }
   0x9   :  { %423 = vmatprep.subr.bf16.mxu0 %v554_v1  ;;  %449 = vmatprep.subr.bf16.mxu1 %v554_v1  ;;  %v120_v54 = vmul.f32 1.442695, %v108_v48  ;;  %v111_v2 = vsub.f32 0.0, %v103_v60  ;;  %v106_v3 = vsub.f32 0.0, %v98_v61  ;;  %s381_s4 = sshll.u32 %s557_s0, 4  ;;  %s391_s6 = sshll.u32 %s558_s5, 4  ;;  %s382_s4 = int_to_ptr.vmem [resolvable:$true] %s381_s4  ;;  %s796_s6 = int_to_ptr.vmem [resolvable:$true] %s391_s6 }
   0xa   :  { %474 = vpow2.f32 %v112_v52  ;;  %v114_v62 = vmul.f32 1.442695, %v105_v55  ;;  %s506_s9 = scalar_lea.vmem %s382_s4, 16  ;;  %s510_s10 = scalar_lea.vmem %s382_s4, 32 }
   0xb   :  { %v329_v34 = vld [vmem:[#allocation3] sm:$0xff]  ;;  %476 = vpow2.f32 %v120_v54  ;;  %p507_p0 = scmp.ne.s32.totalorder %s382_s4, %s506_s9  ;;  %p511_p1 = scmp.lt.s32.totalorder %s382_s4, %s382_s4 }
   0xc   :  { %424 = vmatpush3.bf16.msra.mxu0 %v554_v1  ;;  %457 = vmatpush3.bf16.msra.mxu1 %v554_v1  ;;  %478 = vpow2.f32 %v122_v58  ;;  %p512_p2 = scmp.lt.s32.totalorder %s510_s10, %s506_s9 }
   0xd   :  { %425 = vmatprep.subr.bf16.mxu0 %v554_v1  ;;  %450 = vmatprep.subr.bf16.mxu1 %v554_v1  ;;  %480 = vpow2.f32 %v114_v62 }
   0xe   :  { %p513_p3 = por %p512_p2, %p511_p1 }
  0x10   :  { %426 = vmatpush3.bf16.msra.mxu0 %v554_v1  ;;  %458 = vmatpush3.bf16.msra.mxu1 %v554_v1  ;;  %p514_p4 = pnand %p513_p3, %p507_p0 }
  0x11   :  { %427 = vmatprep.subr.bf16.mxu0 %v554_v1  ;;  %451 = vmatprep.subr.bf16.mxu1 %v554_v1 }
  0x14   :  { %428 = vmatpush3.bf16.msra.mxu0 %v554_v1  ;;  %459 = vmatpush3.bf16.msra.mxu1 %v554_v1 }
  0x15   :  { %429 = vmatprep.subr.bf16.mxu0 %v554_v1  ;;  %452 = vmatprep.subr.bf16.mxu1 %v554_v1 }
  0x18   :  { %430 = vmatpush3.bf16.msra.mxu0 %v554_v1  ;;  %460 = vmatpush3.bf16.msra.mxu1 %v554_v1 }
  0x19   :  { %431 = vmatprep.subr.bf16.mxu0 %v554_v1  ;;  %453 = vmatprep.subr.bf16.mxu1 %v554_v1 }
  0x1c   :  { %432 = vmatpush3.bf16.msra.mxu0 %v554_v1  ;;  %461 = vmatpush3.bf16.msra.mxu1 %v554_v1 }
  0x1d   :  { %433 = vmatprep.subr.bf16.mxu0 %v554_v1  ;;  %454 = vmatprep.subr.bf16.mxu1 %v554_v1 }
  0x20   :  { %434 = vmatpush3.bf16.msra.mxu0 %v554_v1  ;;  %462 = vmatpush3.bf16.msra.mxu1 %v554_v1  ;;  %v99_v1 = vand.u32 2147483647, %v643_v59 }
  0x23   :  { %269 = vmatmul.mubr.bf16.vlgmr.msra.gmra.mrb[0].mxu0 %v232_v5  ;;  %277 = vmatmul.mubr.bf16.vlgmr.msra.gmra.mrb[0].mxu1 %v234_v6  ;;  %v124_v5 = vmul.f32 1.442695, %v110_v63  ;;  %v107_v6 = vsub.f32 0.0, %v99_v1 }
  0x25   :  { %482 = vpow2.f32 %v124_v5  ;;  %v205_v5 = vmax.f32 %v613_v42, 0.0 }
  0xf6   :  { %v435_v9 = vpop.f32.mrb[0].mxu0  ;;  %v441_v10 = vpop.f32.mrb[0].mxu1 }
  0xf7   :  { %v436_v11 = vpop.f32.mrb[1].mxu0  ;;  %v442_v12 = vpop.f32.mrb[1].mxu1 }
  0xf8   :  { %v437_v13 = vadd.f32 %v436_v11, %v435_v9  ;;  %v443_v14 = vadd.f32 %v442_v12, %v441_v10  ;;  %v438_v15 = vpop.f32.mrb[2].mxu0  ;;  %v444_v16 = vpop.f32.mrb[2].mxu1  ;;  %v118_v9 = vmul.f32 1.442695, %v107_v6 }
  0xf9   :  { %v439_v17 = vpop.f32.mrb[3].mxu0  ;;  %v445_v18 = vpop.f32.mrb[3].mxu1 }
  0xfa   :  { %vm285_vm1 = vcmp.gt.f32.partialorder %v437_v13, 0.0  ;;  %vm287_vm2 = vcmp.gt.f32.partialorder %v443_v14, 0.0  ;;  %v440_v19 = vadd.f32 %v439_v17, %v438_v15  ;;  %v446_v20 = vadd.f32 %v445_v18, %v444_v16  ;;  %v475_v10 = vpop.eup %474 }
  0xfb   :  { %v415_v21 = vsel %vm285_vm1, 1.0, %v555_v7  ;;  %v417_v22 = vsel %vm287_vm2, 1.0, %v555_v7  ;;  %v291_v23 = vsel %vm287_vm2, 1, %v556_v8  ;;  %v289_v24 = vsel %vm285_vm1, 1, %v556_v8  ;;  %v648_v11 = vpop.eup %476 }
  0xfc   :  { %vm286_vm3 = vcmp.gt.f32.partialorder %v440_v19, 0.0  ;;  %vm288_vm4 = vcmp.gt.f32.partialorder %v446_v20, 0.0  ;;  %300 = vperm.xlu1 %473, %v291_v23   ;;  %294 = vperm.xlu0 %472, %v289_v24   ;;  %v335_v27 = vsel %vm68_vm0, %v415_v21, 0.0  ;;  %v338_v28 = vsel %vm68_vm0, %v417_v22, 0.0  ;;  %v650_v12 = vpop.eup %478 }
  0xfd   :  { %v416_v25 = vsel %vm286_vm3, 1.0, %v555_v7  ;;  %v292_v26 = vsel %vm288_vm4, 1, %v556_v8  ;;  %v418_v31 = vsel %vm288_vm4, 1.0, %v555_v7  ;;  %v290_v32 = vsel %vm286_vm3, 1, %v556_v8  ;;  %v653_v15 = vpop.eup %480 }
  0xfe   :  { %v336_v29 = vsel %vm68_vm0, %v416_v25, 0.0  ;;  %v340_v35 = vsel %vm68_vm0, %v418_v31, 0.0  ;;  %v126_v7 = vmul.f32 1.442695, %v111_v2  ;;  %v116_v8 = vmul.f32 1.442695, %v106_v3  ;;  %v657_v18 = vpop.eup %482 }
  0xff   :  { %v337_v30 = vadd.f32 %v336_v29, %v335_v27  ;;  %v128_v13 = vadd.f32 1.0, %v475_v10  ;;  %v164_v14 = vadd.f32 1.0, %v648_v11  ;;  %v173_v16 = vadd.f32 1.0, %v650_v12 }
 0x100   :  { %303 = vperm.xlu1 %473, %v292_v26   ;;  %297 = vperm.xlu0 %472, %v290_v32   ;;  %484 = vpow2.f32 %v126_v7  ;;  %v137_v17 = vadd.f32 1.0, %v653_v15  ;;  %v80_v21 = vunpack.c.0.s8 %v589_v4  ;;  %v182_v22 = vadd.f32 1.0, %v657_v18 }
 0x101   :  { %v339_v33 = vadd.f32 %v338_v28, %v337_v30  ;;  %486 = vpow2.f32 %v116_v8  ;;  %v167_v24 = vmul.f32 -0.5, %v648_v11  ;;  %v131_v25 = vmul.f32 -0.5, %v475_v10 }
 0x102   :  { %488 = vpow2.f32 %v118_v9  ;;  %v176_v26 = vmul.f32 -0.5, %v650_v12  ;;  %v85_v28 = vunpack.c.2.s8 %v582_v0  ;;  %v84_v29 = vunpack.c.2.s8 %v589_v4 }
 0x103   :  { %v341_v36 = vadd.f32 %v340_v35, %v339_v33  ;;  %490 = vlog2.f32 %v128_v13  ;;  %v81_v30 = vunpack.c.0.s8 %v582_v0  ;;  %v88_v32 = vcvt.s32.f32 %v80_v21 }
 0x104   :  { %492 = vlog2.f32 %v164_v14  ;;  %v140_v33 = vmul.f32 -0.5, %v653_v15  ;;  %v177_v43 = vadd.f32 1.0, %v176_v26  ;;  %v93_v45 = vcvt.s32.f32 %v85_v28 }
 0x105   :  { %v342_v37 = vadd.f32 %v341_v36, %v329_v34  ;;  %494 = vlog2.f32 %v173_v16  ;;  %v168_v36 = vadd.f32 1.0, %v167_v24  ;;  %v92_v47 = vcvt.s32.f32 %v84_v29 }
 0x106   :  { %496 = vlog2.f32 %v137_v17  ;;  %v89_v48 = vcvt.s32.f32 %v81_v30  ;;  %v141_v50 = vadd.f32 1.0, %v140_v33  ;;  %v208_v52 = vmul.f32 %v88_v32, %v603_v40 }
 0x107   :  { %343 = vst.msk [vmem:[#allocation3] sm:$0xff] %vm68_vm0, %v342_v37  ;;  %498 = vlog2.f32 %v182_v22  ;;  %v132_v37 = vadd.f32 1.0, %v131_v25  ;;  %v682_v55 = vmul.f32 %v648_v11, %v168_v36  ;;  %v170_v61 = vand.u32 2147483647, %v648_v11 }
 0x108   :  { %v694_v63 = vmul.f32 %v650_v12, %v177_v43  ;;  %v143_v1 = vand.u32 2147483647, %v653_v15  ;;  %v179_v2 = vand.u32 2147483647, %v650_v12  ;;  %v204_v3 = vmax.f32 %v608_v41, 0.0 }
 0x109   :  { %v684_v56 = vmul.f32 %v475_v10, %v132_v37  ;;  %v701_v6 = vmul.f32 %v92_v47, %v608_v41  ;;  %v704_v7 = vmul.f32 %v93_v45, %v613_v42  ;;  %v200_v8 = vmax.f32 %v603_v40, 0.0 }
 0x10a   :  { %v659_v19 = vpop.eup %484  ;;  %v83_v9 = vunpack.c.1.s8 %v582_v0  ;;  %v712_v12 = vmul.f32 %v653_v15, %v141_v50  ;;  %vm720_vm6 = vcmp.lt.f32.partialorder %v143_v1, 0.0004427343  ;;  %v87_v21 = vunpack.c.3.s8 %v582_v0 }
 0x10b   :  { %v661_v20 = vpop.eup %486  ;;  %v191_v27 = vadd.f32 1.0, %v659_v19  ;;  %v86_v22 = vunpack.c.3.s8 %v589_v4  ;;  %vm726_vm7 = vcmp.lt.f32.partialorder %v170_v61, 0.0004427343  ;;  %vm730_vm8 = vcmp.lt.f32.partialorder %v179_v2, 0.0004427343 }
 0x10c   :  { %v665_v23 = vpop.eup %488  ;;  %v146_v31 = vadd.f32 1.0, %v661_v20  ;;  %v149_v13 = vmul.f32 -0.5, %v661_v20  ;;  %v201_v25 = vmax.f32 %v621_v46, 0.0  ;;  %v185_v26 = vmul.f32 -0.5, %v657_v18 }
 0x10d   :  { %v155_v34 = vadd.f32 1.0, %v665_v23  ;;  %v491_v35 = vpop.eup %490  ;;  %500 = vlog2.f32 %v191_v27  ;;  %v158_v14 = vmul.f32 -0.5, %v665_v23  ;;  %v194_v27 = vmul.f32 -0.5, %v659_v19 }
 0x10e   :  { %v362_v38 = vld [vmem:[#allocation3] sm:$0xff]  ;;  %502 = vlog2.f32 %v146_v31  ;;  %v676_v49 = vmul.f32 0.6931472, %v491_v35  ;;  %v209_v29 = vmul.f32 %v89_v48, %v621_v46  ;;  %v216_v0 = vsub.f32 %v200_v8, %v208_v52 }
 0x10f   :  { %v363_v39 = vsel %vm68_vm0, %v362_v38, 0.0  ;;  %v134_v38 = vand.u32 2147483647, %v475_v10  ;;  %504 = vlog2.f32 %v155_v34  ;;  %v82_v10 = vunpack.c.1.s8 %v589_v4 }
 0x110   :  { %v91_v30 = vcvt.s32.f32 %v83_v9  ;;  %v150_v34 = vadd.f32 1.0, %v149_v13  ;;  %v159_v35 = vadd.f32 1.0, %v158_v14  ;;  %v95_v37 = vcvt.s32.f32 %v87_v21 }
 0x111   :  { %vm686_vm5 = vcmp.lt.f32.partialorder %v134_v38, 0.0004427343  ;;  %v90_v4 = vcvt.s32.f32 %v82_v10  ;;  %v94_v38 = vcvt.s32.f32 %v86_v22  ;;  %v161_v43 = vand.u32 2147483647, %v665_v23 }
 0x112   :  { %v136_v17 = vsel %vm686_vm5, %v684_v56, %v676_v49  ;;  %v186_v46 = vadd.f32 1.0, %v185_v26  ;;  %v195_v45 = vadd.f32 1.0, %v194_v27  ;;  %v197_v47 = vand.u32 2147483647, %v659_v19 }
 0x113   :  { %v202_v48 = vmax.f32 %v638_v57, 0.0  ;;  %v203_v49 = vmax.f32 %v643_v59, 0.0  ;;  %v210_v50 = vmul.f32 %v90_v4, %v638_v57  ;;  %v211_v52 = vmul.f32 %v91_v30, %v643_v59 }
 0x114   :  { %v151_v58 = vmul.f32 %v661_v20, %v150_v34  ;;  %v160_v61 = vmul.f32 %v665_v23, %v159_v35  ;;  %v217_v1 = vsub.f32 %v201_v25, %v209_v29  ;;  %vm756_vm10 = vcmp.lt.f32.partialorder %v161_v43, 0.0004427343 }
 0x115   :  { %v206_v57 = vmax.f32 %v627_v51, 0.0  ;;  %v207_v59 = vmax.f32 %v632_v53, 0.0  ;;  %v214_v10 = vmul.f32 %v94_v38, %v627_v51  ;;  %v187_v23 = vmul.f32 %v657_v18, %v186_v46 }
 0x116   :  { %v219_v13 = vsub.f32 %v203_v49, %v211_v52  ;;  %vm770_vm12 = vcmp.lt.f32.partialorder %v197_v47, 0.0004427343  ;;  %v220_v21 = vsub.f32 %v204_v3, %v701_v6  ;;  %v221_v22 = vsub.f32 %v205_v5, %v704_v7 }
 0x117   :  { %v224_v26 = vadd.f32 %v216_v0, %v136_v17  ;;  %vm360_vm1 = vcmask 0  }
 0x124   :  { %364 = vadd.xlane.f32.xlu1 %v363_v39  ;;  %v493_v39 = vpop.eup %492 }
 0x125   :  { %v495_v44 = vpop.eup %494  ;;  %v679_v54 = vmul.f32 0.6931472, %v493_v39  ;;  %v152_v39 = vand.u32 2147483647, %v661_v20  ;;  %v215_v20 = vmul.f32 %v95_v37, %v632_v53 }
 0x126   :  { %v497_v60 = vpop.eup %496  ;;  %v691_v62 = vmul.f32 0.6931472, %v495_v44  ;;  %v188_v44 = vand.u32 2147483647, %v657_v18 }
 0x127   :  { %v709_v11 = vmul.f32 0.6931472, %v497_v60  ;;  %v499_v16 = vpop.eup %498  ;;  %vm752_vm9 = vcmp.lt.f32.partialorder %v152_v39, 0.0004427343  ;;  %v172_v18 = vsel %vm726_vm7, %v682_v55, %v679_v54  ;;  %v223_v29 = vsub.f32 %v207_v59, %v215_v20 }
 0x128   :  { %v501_v28 = vpop.eup %500  ;;  %v184_v33 = vmul.f32 0.6931472, %v499_v16  ;;  %vm766_vm11 = vcmp.lt.f32.partialorder %v188_v44, 0.0004427343  ;;  %v228_v41 = vadd.f32 %v220_v21, %v172_v18 }
 0x129   :  { %v503_v31 = vpop.eup %502  ;;  %v145_v32 = vsel %vm720_vm6, %v712_v12, %v709_v11  ;;  %v193_v2 = vmul.f32 0.6931472, %v501_v28  ;;  %v196_v11 = vmul.f32 %v659_v19, %v195_v45  ;;  %v218_v12 = vsub.f32 %v202_v48, %v210_v50 }
 0x12a   :  { %v505_v36 = vpop.eup %504  ;;  %v148_v56 = vmul.f32 0.6931472, %v503_v31  ;;  %v181_v19 = vsel %vm730_vm8, %v694_v63, %v691_v62  ;;  %v225_v27 = vadd.f32 %v217_v1, %v145_v32  ;;  %v222_v28 = vsub.f32 %v206_v57, %v214_v10 }
 0x12b   :  { %v157_v60 = vmul.f32 0.6931472, %v505_v36  ;;  %v190_v54 = vsel %vm766_vm11, %v187_v23, %v184_v33  ;;  %v199_v55 = vsel %vm770_vm12, %v196_v11, %v193_v2  ;;  %v229_v3 = vadd.f32 %v221_v22, %v181_v19 }
 0x12c   :  { %v154_v40 = vsel %vm752_vm9, %v151_v58, %v148_v56  ;;  %v230_v42 = vadd.f32 %v222_v28, %v190_v54  ;;  %v231_v5 = vadd.f32 %v223_v29, %v199_v55 }
 0x12d   :  { %v163_v51 = vsel %vm756_vm10, %v160_v61, %v157_v60  ;;  %v226_v62 = vadd.f32 %v218_v12, %v154_v40 }
 0x12e   :  { %v227_v63 = vadd.f32 %v219_v13, %v163_v51 }
 0x17b   :  { %v301_v53 = vpop.permute.xlu1 %300  ;;  %v295_v25 = vpop.permute.xlu0 %294 }
 0x17c   :  { %vm305_vm13 = vcmp.eq.s32.totalorder %v295_v25, 1  ;;  %vm307_vm14 = vcmp.eq.s32.totalorder %v301_v53, 1 }
 0x17d   :  { %v309_v7 = vsel %vm305_vm13, %v224_v26, 0.0  ;;  %v310_v17 = vsel %vm305_vm13, %v225_v27, 0.0  ;;  %v313_v31 = vsel %vm307_vm14, %v228_v41, 0.0  ;;  %v314_v32 = vsel %vm307_vm14, %v229_v3, 0.0 }
 0x17f   :  { %v304_v6 = vpop.permute.xlu1 %303  ;;  %v298_v15 = vpop.permute.xlu0 %297 }
 0x180   :  { %vm306_vm15 = vcmp.eq.s32.totalorder %v298_v15, 1  ;;  %vm308_vm0 = vcmp.eq.s32.totalorder %v304_v6, 1 }
 0x181   :  { %v311_v24 = vsel %vm306_vm15, %v226_v62, 0.0  ;;  %v312_v0 = vsel %vm306_vm15, %v227_v63, 0.0  ;;  %v315_v35 = vsel %vm308_vm0, %v230_v42, 0.0  ;;  %v316_v36 = vsel %vm308_vm0, %v231_v5, 0.0 }
 0x182   :  { %v319_v30 = vadd.f32 %v311_v24, %v309_v7  ;;  %v322_v4 = vadd.f32 %v312_v0, %v310_v17 }
 0x184   :  { %v320_v33 = vadd.f32 %v319_v30, %v313_v31  ;;  %v323_v34 = vadd.f32 %v322_v4, %v314_v32 }
 0x186   :  { %v321_v37 = vadd.f32 %v320_v33, %v315_v35  ;;  %v324_v38 = vadd.f32 %v323_v34, %v316_v36 }
 0x188   :  { %v349_v39 = vadd.f32 %v324_v38, %v321_v37 }
 0x18a   :  { %350 = vadd.xlane.f32.xlu0 %v349_v39 }
 0x1b1   :  { %v365_v43 = vpop.xlane.xlu1 %364 }
 0x1b2   :  { %v366_v46 = vrot.slane %v365_v43, 4 }
 0x1b4   :  { %v367_v44 = vadd.f32 %v366_v46, %v365_v43 }
 0x1b6   :  { %v368_v45 = vrot.slane %v367_v44, 2 }
 0x1b8   :  { %v369_v50 = vadd.f32 %v368_v45, %v367_v44 }
 0x1ba   :  { %v370_v58 = vrot.slane %v369_v50, 1 }
 0x1bc   :  { %v371_v1 = vadd.f32 %v370_v58, %v369_v50 }
 0x217   :  { %v351_v47 = vpop.xlane.xlu0 %350 }
 0x218   :  { %v352_v48 = vrot.slane %v351_v47, 4 }
 0x21a   :  { %v353_v49 = vadd.f32 %v352_v48, %v351_v47 }
 0x21c   :  { %v354_v52 = vrot.slane %v353_v49, 2 }
 0x21e   :  { %v355_v56 = vadd.f32 %v354_v52, %v353_v49 }
 0x220   :  { %v356_v60 = vrot.slane %v355_v56, 1 }
 0x222   :  { %v357_v61 = vadd.f32 %v356_v60, %v355_v56 }
 0x224   :  { %463 = vpush %v357_v61 }
 0x225   :  { %465 = vpush %v371_v1 }
 0x255   :  { %s464_s7 = spop %463 }
 0x256   :  { %v359_v2 = vstv %s464_s7  ;;  %s466_s8 = spop %465 }
 0x257   :  { %v373_v8 = vstv %s466_s8  ;;  %361 = vst.msk [vmem:[#allocation4] sm:$0x1] %vm360_vm1, %v359_v2 }
 0x258   :  { %374 = vst.msk [vmem:[#allocation6] sm:$0x1] %vm360_vm1, %v373_v8 }
 0x259   :  { %517 = shalt.err (!%p514_p4)
}
 0x25a   :  { %s518_s13 = scalar_lea.hbm %s830_s2, 16 }
 0x25b   :  { %p519_p5 = scmp.ne.s32.totalorder %s830_s2, %s518_s13  ;;  %p522_p6 = scmp.lt.u32.totalorder %s518_s13, %s830_s2 }
 0x25d   :  { %p524_p7 = pnand %p522_p6, %p519_p5 }
 0x25f   :  { %527 = shalt.err (!%p524_p7)
}
 0x260   :  { %384 = dma.vmem_to_hbm [thread:$0]  %s382_s4, 16, %s830_s2, [#allocation5]  }
 0x261   :  { %s528_s19 = scalar_lea.vmem %s796_s6, 16  ;;  %s532_s20 = scalar_lea.vmem %s796_s6, 32 }
 0x262   :  { %p529_p8 = scmp.ne.s32.totalorder %s796_s6, %s528_s19  ;;  %p533_p9 = scmp.lt.s32.totalorder %s796_s6, %s796_s6 }
 0x263   :  { %p534_p10 = scmp.lt.s32.totalorder %s532_s20, %s528_s19 }
 0x265   :  { %p535_p11 = por %p534_p10, %p533_p9 }
 0x267   :  { %p536_p12 = pnand %p535_p11, %p529_p8 }
 0x269   :  { %539 = shalt.err (!%p536_p12)
}
 0x26a   :  { %s540_s23 = scalar_lea.hbm %s831_s3, 16 }
 0x26b   :  { %p541_p13 = scmp.ne.s32.totalorder %s831_s3, %s540_s23  ;;  %p544_p0 = scmp.lt.u32.totalorder %s540_s23, %s831_s3 }
 0x26d   :  { %p546_p1 = pnand %p544_p0, %p541_p13 }
 0x26f   :  { %549 = shalt.err (!%p546_p1)
}
 0x270   :  { %394 = dma.vmem_to_hbm [thread:$0]  %s796_s6, 16, %s831_s3, [#allocation7]  }
 0x271   :  { %550 = dma.done.wait [#allocation5], 16  }
 0x272   :  { %551 = vsyncadd [#allocation5], 4294967280 }
 0x273   :  { %552 = dma.done.wait [#allocation7], 16  }
 0x274   :  { %553 = vsyncadd [#allocation7], 4294967280 }
 0x275   :  { %401 = vsyncpa [#allocation5], 1 }
 0x276   :  { %402 = vsyncpa [#allocation7], 1 }

</bundles_post_ra>
